<compile_context>
chip_gen: v7x
topology: tpu7x:2x2x1
jax: 0.10.0
libtpu: 0.0.40
codegen_flags: <defaults>
</compile_context>

<pallas_src>
import functools

import jax
import jax.numpy as jnp
from jax.experimental import pallas as pl
from jax.experimental.pallas import tpu as pltpu


def _round_up(x, m):
    return ((x + m - 1) // m) * m


def _bce_focal_tile_kernel(preds_ref, targets_ref, out_ref, *,
                           alpha, gamma, smooth_eps, num_classes):
    """One (TILE_B, C) tile -> per-sample class-sums written as (1, 1, TILE_B)."""
    x = preds_ref[...].astype(jnp.float32)
    t = targets_ref[...].astype(jnp.float32)

    # targets.clamp(smooth_eps / num_classes, 1 - smooth_eps).
    # With smooth_eps == 0 this is clamp(0, 1), a no-op for valid soft labels,
    # so skip the two compares/selects entirely in the default config.
    if smooth_eps != 0.0:
        t = jnp.clip(t, smooth_eps / num_classes, 1.0 - smooth_eps)

    # One exp per element: z = exp(-|x|) feeds both the numerically stable
    # BCEWithLogits log term and the sigmoid (no overflow for large |x|, one
    # trip through the single-slot EUP).
    z = jnp.exp(-jnp.abs(x))
    bce = jnp.maximum(x, 0.0) - x * t + jnp.log1p(z)

    # sigmoid(x): approx reciprocal on the otherwise-idle EUP slot plus one
    # Newton refinement (r*(2 - a*r)) -> ~full f32 precision, off the VALU
    # divide sequence.
    opz = 1.0 + z
    r = pl.reciprocal(opz, approx=True)
    r = r * (2.0 - opz * r)              # Newton step: rel-err ~ (2^-12)^2
    p = jnp.where(x >= 0.0, r, z * r)    # sigmoid(x), cancellation-free
    q = 1.0 - p                          # matches reference (1 - probas)

    # Focal modulation.  Integer gamma (default 2.0) -> (gi-1) VALU multiplies
    # instead of pow == exp(gamma*log(.)) on the EUP.
    if float(gamma) == int(gamma) and 0 <= int(gamma) <= 8:
        gi = int(gamma)
        if gi == 0:
            pg = jnp.ones_like(p)
            qg = jnp.ones_like(q)
        else:
            pg, qg = p, q
            for _ in range(gi - 1):
                pg = pg * p
                qg = qg * q
    else:
        # TODO(synk): non-integer gamma falls back to pow (EUP exp+log path).
        pg = p ** gamma
        qg = q ** gamma

    loss = (t * alpha * qg + (1.0 - t) * pg) * bce

    # Per-sample sum over classes; batch mean / rating weighting happens in
    # the wrapper (keeps the output lane-dense and the grid axis parallel).
    out_ref[...] = jnp.sum(loss, axis=1).reshape(1, 1, -1)


def bce_focal_loss(preds, targets, rating, *, alpha=0.25, gamma=2.0,
                   smooth_eps=0.0, num_classes=182, use_rating=False,
                   use_label_weight=False, max_tile_b=2048):
    """Pallas TPU implementation of BCEFocalLoss.forward. Returns scalar f32.

    preds/targets: (B, C) logits / soft labels (f32 or bf16; compute is f32).
    rating:        (B,) per-sample weights (only used when use_rating=True).
    """
    B, C = preds.shape

    # Tile selection.  No padding copy: grid = cdiv(B, tile_b); the ragged
    # final tile's OOB rows hold garbage that is discarded by the [:B] slice
    # below and never enters a reduction.  For small B we aim for >= 2 tiles
    # so both v7x TensorCores get work.
    if B > max_tile_b:
        tile_b = max_tile_b                       # default 2048: multiple of 128
    else:
        tile_b = min(_round_up(pl.cdiv(B, 2), 8), _round_up(B, 8))
    num_tiles = pl.cdiv(B, tile_b)

    # Scoped-VMEM budget: 2 inputs x 2 pipeline buffers x tile x padded lanes
    # (counted at 4 B/elem) plus headroom; capped well below v7x's 64 MiB.
    padded_c = _round_up(C, 128)
    io_bytes = 2 * 2 * tile_b * padded_c * 4
    vmem_limit = min(56 * 1024 * 1024,
                     max(32 * 1024 * 1024, io_bytes + 16 * 1024 * 1024))

    kernel = functools.partial(
        _bce_focal_tile_kernel,
        alpha=float(alpha), gamma=float(gamma), smooth_eps=float(smooth_eps),
        num_classes=int(num_classes))

    per_tile = pl.pallas_call(
        kernel,
        out_shape=jax.ShapeDtypeStruct((num_tiles, 1, tile_b), jnp.float32),
        grid=(num_tiles,),
        in_specs=[
            pl.BlockSpec((tile_b, C), lambda i: (i, 0)),
            pl.BlockSpec((tile_b, C), lambda i: (i, 0)),
        ],
        out_specs=pl.BlockSpec((1, 1, tile_b), lambda i: (i, 0, 0)),
        compiler_params=pltpu.CompilerParams(
            dimension_semantics=("parallel",),
            vmem_limit_bytes=vmem_limit),
    )(preds, targets)

    # Per-sample class-sums for the real (unpadded) rows only.
    per_sample = per_tile.reshape(-1)[:B]

    if use_rating:
        # loss.mean(1); loss = rating * loss; loss.mean()
        r = rating.reshape(-1).astype(jnp.float32)
        return jnp.sum(r * per_sample) / (B * C)
    # use_label_weight: loss.mean(0).mean() == full mean -> same as default
    # (the reference forward applies no actual label weights).
    return jnp.sum(per_sample) / (B * C)


def _reference(preds, targets, rating, *, alpha=0.25, gamma=2.0,
               smooth_eps=0.0, num_classes=182, use_rating=False,
               use_label_weight=False):
    """Pure-JAX reference mirroring the PyTorch module."""
    x = preds.astype(jnp.float32)
    t = jnp.clip(targets.astype(jnp.float32),
                 smooth_eps / num_classes, 1.0 - smooth_eps)
    bce = jnp.maximum(x, 0.0) - x * t + jnp.log1p(jnp.exp(-jnp.abs(x)))
    p = jax.nn.sigmoid(x)
    loss = t * alpha * (1.0 - p) ** gamma * bce + (1.0 - t) * p ** gamma * bce
    if use_rating:
        loss = jnp.mean(loss, axis=1)
        loss = rating * loss
    elif use_label_weight:
        loss = jnp.mean(loss, axis=0)
    return jnp.mean(loss)


if __name__ == "__main__":
    key = jax.random.PRNGKey(0)

    def make_inputs(k, B, C):
        k1, k2, k3 = jax.random.split(k, 3)
        preds = jax.random.normal(k1, (B, C), dtype=jnp.float32) * 2.0
        targets = jax.random.bernoulli(k2, 0.1, (B, C)).astype(jnp.float32)
        rating = jax.random.uniform(k3, (B,), dtype=jnp.float32) + 0.5
        return preds, targets, rating

    ok = True
    cases = [
        ((8, 182), dict(), 2048),                      # single-tile path
        ((8, 182), dict(use_rating=True), 2048),
        ((8, 182), dict(use_label_weight=True), 2048),
        ((8, 182), dict(smooth_eps=0.05), 2048),
        ((13, 182), dict(use_rating=True), 2048),      # ragged last tile, 2 tiles
        ((20, 182), dict(), 8),                        # ragged multi-tile grid (3 tiles)
        ((2, 4), dict(num_classes=4), 2048),           # tiny shapes
    ]
    for (B, C), kwargs, mtb in cases:
        preds, targets, rating = make_inputs(
            jax.random.fold_in(key, B * 1000 + C), B, C)
        out = jax.block_until_ready(
            bce_focal_loss(preds, targets, rating, max_tile_b=mtb, **kwargs))
        ref = _reference(preds, targets, rating, **kwargs)
        if not jnp.allclose(out, ref, rtol=1e-4, atol=1e-6):
            ok = False
            print("MISMATCH", (B, C), kwargs, float(out), float(ref))

    # bf16 inputs are accepted (compute stays f32); smoke-test only.
    preds, targets, rating = make_inputs(key, 8, 182)
    jax.block_until_ready(
        bce_focal_loss(preds.astype(jnp.bfloat16),
                       targets.astype(jnp.bfloat16), rating))

    if ok:
        print("KERNEL_OK")
</pallas_src>

<mosaic_0001>
module attributes {stable_mosaic.version = 11 : i64} {
  func.func @_bce_focal_tile_kernel(%arg0: i32, %arg1: memref<8x182xf32, #tpu.memory_space<vmem>>, %arg2: memref<8x182xf32, #tpu.memory_space<vmem>>, %arg3: memref<1x1x8xf32, #tpu.memory_space<vmem>>) attributes {dimension_semantics = [#tpu.dimension_semantics<parallel>], iteration_bounds = array<i64: 1>, scalar_prefetch = 0 : i64, scratch_operands = 0 : i64, tpu.core_type = #tpu.core_type<tc>, window_params = [{transform_indices = @transform_0, window_bounds = array<i64: 8, 182>}, {transform_indices = @transform_1, window_bounds = array<i64: 8, 182>}, {transform_indices = @transform_2, window_bounds = array<i64: 1, 1, 8>}]} {
    %c0 = arith.constant 0 : index
    %c0_0 = arith.constant 0 : index
    %0 = vector.load %arg1[%c0, %c0_0] : memref<8x182xf32, #tpu.memory_space<vmem>>, vector<8x182xf32>
    %c0_1 = arith.constant 0 : index
    %c0_2 = arith.constant 0 : index
    %1 = vector.load %arg2[%c0_1, %c0_2] : memref<8x182xf32, #tpu.memory_space<vmem>>, vector<8x182xf32>
    %2 = math.absf %0 : vector<8x182xf32>
    %cst = arith.constant 0.000000e+00 : f32
    %3 = vector.broadcast %cst : f32 to vector<8x182xf32>
    %4 = arith.subf %3, %2 : vector<8x182xf32>
    %5 = math.exp %4 : vector<8x182xf32>
    %cst_3 = arith.constant 0.000000e+00 : f32
    %6 = vector.broadcast %cst_3 : f32 to vector<8x182xf32>
    %7 = arith.maximumf %0, %6 : vector<8x182xf32>
    %8 = arith.mulf %0, %1 : vector<8x182xf32>
    %9 = arith.subf %7, %8 : vector<8x182xf32>
    %10 = math.log1p %5 : vector<8x182xf32>
    %11 = arith.addf %9, %10 : vector<8x182xf32>
    %cst_4 = arith.constant 1.000000e+00 : f32
    %12 = vector.broadcast %cst_4 : f32 to vector<8x182xf32>
    %13 = arith.addf %12, %5 : vector<8x182xf32>
    %14 = tpu.reciprocal %13 {approx = true} : vector<8x182xf32> -> vector<8x182xf32>
    %15 = arith.mulf %13, %14 : vector<8x182xf32>
    %cst_5 = arith.constant 2.000000e+00 : f32
    %16 = vector.broadcast %cst_5 : f32 to vector<8x182xf32>
    %17 = arith.subf %16, %15 : vector<8x182xf32>
    %18 = arith.mulf %14, %17 : vector<8x182xf32>
    %cst_6 = arith.constant 0.000000e+00 : f32
    %19 = vector.broadcast %cst_6 : f32 to vector<8x182xf32>
    %20 = arith.cmpf oge, %0, %19 : vector<8x182xf32>
    %21 = arith.mulf %5, %18 : vector<8x182xf32>
    %22 = arith.select %20, %18, %21 : vector<8x182xi1>, vector<8x182xf32>
    %cst_7 = arith.constant 1.000000e+00 : f32
    %23 = vector.broadcast %cst_7 : f32 to vector<8x182xf32>
    %24 = arith.subf %23, %22 : vector<8x182xf32>
    %25 = arith.mulf %22, %22 : vector<8x182xf32>
    %26 = arith.mulf %24, %24 : vector<8x182xf32>
    %cst_8 = arith.constant 2.500000e-01 : f32
    %27 = vector.broadcast %cst_8 : f32 to vector<8x182xf32>
    %28 = arith.mulf %1, %27 : vector<8x182xf32>
    %29 = arith.mulf %28, %26 : vector<8x182xf32>
    %cst_9 = arith.constant 1.000000e+00 : f32
    %30 = vector.broadcast %cst_9 : f32 to vector<8x182xf32>
    %31 = arith.subf %30, %1 : vector<8x182xf32>
    %32 = arith.mulf %31, %25 : vector<8x182xf32>
    %33 = arith.addf %29, %32 : vector<8x182xf32>
    %34 = arith.mulf %33, %11 : vector<8x182xf32>
    %cst_10 = arith.constant dense<0.000000e+00> : vector<8xf32>
    %35 = vector.multi_reduction <add>, %34, %cst_10 [1] : vector<8x182xf32> to vector<8xf32>
    %36 = vector.shape_cast %35 : vector<8xf32> to vector<1x1x8xf32>
    %c0_11 = arith.constant 0 : index
    %c0_12 = arith.constant 0 : index
    %c0_13 = arith.constant 0 : index
    %37 = vector.load %arg3[%c0_11, %c0_12, %c0_13] : memref<1x1x8xf32, #tpu.memory_space<vmem>>, vector<1x1x8xf32>
    tpu.vector_store %arg3[%c0_11, %c0_12, %c0_13], %36 {strides = array<i32>} : memref<1x1x8xf32, #tpu.memory_space<vmem>>, vector<1x1x8xf32>,
    return
  }
  func.func @transform_0(%arg0: i32) -> (i32, i32) {
    %c0_i32 = arith.constant 0 : i32
    %c0_i32_0 = arith.constant 0 : i32
    return %arg0, %c0_i32 : i32, i32
  }
  func.func @transform_1(%arg0: i32) -> (i32, i32) {
    %c0_i32 = arith.constant 0 : i32
    %c0_i32_0 = arith.constant 0 : i32
    return %arg0, %c0_i32 : i32, i32
  }
  func.func @transform_2(%arg0: i32) -> (i32, i32, i32) {
    %c0_i32 = arith.constant 0 : i32
    %c0_i32_0 = arith.constant 0 : i32
    %c0_i32_1 = arith.constant 0 : i32
    return %arg0, %c0_i32, %c0_i32_0 : i32, i32, i32
  }
}

</mosaic_0001>

<bundles_post_ra>
// kernel: tpu_custom_call.1
= control target key start
LH: loop header
LB: loop body
LE: loop exit
PB: predicated region body
PF: predicated region fallthrough
CT: control target
= control target key end

     0   :  { %7 = vsyncpa [#allocation3], 0  ;;  %s292_s0 = inlined_call_operand.hbm [shape: f32[8,182], index: 0, kind: input, shape index: {}]   ;;  %s293_s1 = inlined_call_operand.hbm [shape: f32[8,182], index: 1, kind: input, shape index: {}]   ;;  %s294_s2 = inlined_call_operand.hbm [shape: f32[1,1,8], index: 2, kind: output, shape index: {}]  }
   0x1   :  { %8 = vsyncpa [#allocation6], 0 }
   0x2   :  { %9 = vsyncpa [#allocation4], 0  ;;  %s226_s9 = smov [#allocation2]   ;;  %s227_s11 = smov [#allocation5]  }
   0x3   :  { %s16_s10 = sshll.u32 %s226_s9, 4  ;;  %s26_s12 = sshll.u32 %s227_s11, 4  ;;  %s17_s10 = int_to_ptr.vmem [resolvable:$true] %s16_s10  ;;  %s27_s12 = int_to_ptr.vmem [resolvable:$true] %s26_s12 }
   0x4   :  { %s154_s15 = scalar_lea.hbm %s292_s0, 256 }
   0x5   :  { %p155_p0 = scmp.ne.s32.totalorder %s292_s0, %s154_s15  ;;  %p158_p1 = scmp.lt.u32.totalorder %s154_s15, %s292_s0 }
   0x7   :  { %p160_p2 = pnand %p158_p1, %p155_p0 }
   0x9   :  { %163 = shalt.err (!%p160_p2)
}
   0xa   :  { %s164_s20 = scalar_lea.vmem %s17_s10, 256  ;;  %p169_p4 = scmp.lt.s32.totalorder %s17_s10, %s17_s10 }
   0xb   :  { %p165_p3 = scmp.ne.s32.totalorder %s17_s10, %s164_s20  ;;  %p170_p5 = scmp.lt.s32.totalorder %s164_s20, %s164_s20 }
   0xd   :  { %p171_p6 = por %p170_p5, %p169_p4 }
   0xf   :  { %p172_p7 = pnand %p171_p6, %p165_p3 }
  0x11   :  { %175 = shalt.err (!%p172_p7)
}
  0x12   :  { %19 = dma.hbm_to_vmem [thread:$0]  %s292_s0, 256, %s17_s10, [#allocation3]  }
  0x13   :  { %s176_s25 = scalar_lea.hbm %s293_s1, 256 }
  0x14   :  { %p177_p8 = scmp.ne.s32.totalorder %s293_s1, %s176_s25  ;;  %p180_p9 = scmp.lt.u32.totalorder %s176_s25, %s293_s1 }
  0x16   :  { %p182_p10 = pnand %p180_p9, %p177_p8 }
  0x18   :  { %185 = shalt.err (!%p182_p10)
}
  0x19   :  { %s186_s30 = scalar_lea.vmem %s27_s12, 256  ;;  %p191_p12 = scmp.lt.s32.totalorder %s27_s12, %s27_s12 }
  0x1a   :  { %p187_p11 = scmp.ne.s32.totalorder %s27_s12, %s186_s30  ;;  %p192_p13 = scmp.lt.s32.totalorder %s186_s30, %s186_s30 }
  0x1c   :  { %p193_p0 = por %p192_p13, %p191_p12 }
  0x1e   :  { %p194_p1 = pnand %p193_p0, %p187_p11 }
  0x20   :  { %197 = shalt.err (!%p194_p1)
}
  0x21   :  { %29 = dma.hbm_to_vmem [thread:$0]  %s293_s1, 256, %s27_s12, [#allocation6]  }
  0x22   :  { %220 = dma.done.wait [#allocation3], 256  }
  0x23   :  { %221 = vsyncadd [#allocation3], 4294967040 }
  0x24   :  { %222 = dma.done.wait [#allocation6], 256  }
  0x25   :  { %223 = vsyncadd [#allocation6], 4294967040  ;;  %v36_v0 = vld [vmem:[#allocation2] sm:$0xff]  ;;  %v37_v1 = vld [vmem:[#allocation2 + $0x8] sm:$0xff]  ;;  %vm108_vm4 = vcmask 441344   ;;  %s228_s1 = smov [#allocation7]  }
  0x26   :  { %v40_v2 = vand.u32 2147483647, %v36_v0  ;;  %v41_v3 = vand.u32 2147483647, %v37_v1  ;;  %v38_v12 = vld [vmem:[#allocation5] sm:$0xff]  ;;  %v39_v18 = vld [vmem:[#allocation5 + $0x8] sm:$0xff] }
  0x27   :  { %v48_v19 = vmax.f32 %v36_v0, 0.0  ;;  %v50_v20 = vmul.f32 %v38_v12, %v36_v0  ;;  %v49_v29 = vmax.f32 %v37_v1, 0.0  ;;  %v51_v30 = vmul.f32 %v39_v18, %v37_v1  ;;  %s129_s4 = sshll.u32 %s228_s1, 4  ;;  %s130_s4 = int_to_ptr.vmem [resolvable:$true] %s129_s4 }
  0x28   :  { %v42_v4 = vsub.f32 0.0, %v40_v2  ;;  %v43_v5 = vsub.f32 0.0, %v41_v3  ;;  %vm84_vm0 = vcmp.ge.f32.partialorder %v36_v0, 0.0  ;;  %vm85_vm1 = vcmp.ge.f32.partialorder %v37_v1, 0.0  ;;  %s198_s5 = scalar_lea.vmem %s130_s4, 16  ;;  %s202_s6 = scalar_lea.vmem %s130_s4, 32 }
  0x29   :  { %v52_v33 = vsub.f32 %v48_v19, %v50_v20  ;;  %v100_v38 = vsub.f32 1.0, %v38_v12  ;;  %v96_v45 = vmul.f32 0.25, %v38_v12  ;;  %v101_v46 = vsub.f32 1.0, %v39_v18  ;;  %p199_p2 = scmp.ne.s32.totalorder %s130_s4, %s198_s5  ;;  %p203_p3 = scmp.lt.s32.totalorder %s130_s4, %s130_s4 }
  0x2a   :  { %v44_v6 = vmul.f32 1.442695, %v42_v4  ;;  %v46_v7 = vmul.f32 1.442695, %v43_v5  ;;  %v53_v47 = vsub.f32 %v49_v29, %v51_v30  ;;  %v97_v54 = vmul.f32 0.25, %v39_v18  ;;  %p204_p4 = scmp.lt.s32.totalorder %s202_s6, %s198_s5 }
  0x2b   :  { %vm121_vm5 = vcmask 57344  }
  0x2c   :  { %142 = vpow2.f32 %v44_v6  ;;  %v114_v6 = vlaneseq  ;;  %p205_p5 = por %p204_p4, %p203_p3 }
  0x2d   :  { %144 = vpow2.f32 %v46_v7 }
  0x2e   :  { %v115_v7 = vand.u32 127, %v114_v6  ;;  %p206_p6 = pnand %p205_p5, %p199_p2 }
  0x36   :  { %v143_v8 = vpop.eup %142 }
  0x37   :  { %v145_v9 = vpop.eup %144  ;;  %v54_v10 = vadd.f32 1.0, %v143_v8  ;;  %v57_v13 = vmul.f32 -0.5, %v143_v8  ;;  %v60_v25 = vand.u32 2147483647, %v143_v8 }
  0x38   :  { %v63_v11 = vadd.f32 1.0, %v145_v9  ;;  %v66_v15 = vmul.f32 -0.5, %v145_v9  ;;  %v69_v31 = vand.u32 2147483647, %v145_v9 }
  0x39   :  { %146 = vrcp.f32 %v54_v10  ;;  %v58_v22 = vadd.f32 1.0, %v57_v13  ;;  %vm268_vm2 = vcmp.lt.f32.partialorder %v60_v25, 0.0004427343 }
  0x3a   :  { %148 = vrcp.f32 %v63_v11  ;;  %v67_v26 = vadd.f32 1.0, %v66_v15  ;;  %vm272_vm3 = vcmp.lt.f32.partialorder %v69_v31, 0.0004427343 }
  0x3b   :  { %150 = vlog2.f32 %v54_v10  ;;  %v59_v36 = vmul.f32 %v143_v8, %v58_v22 }
  0x3c   :  { %152 = vlog2.f32 %v63_v11  ;;  %v68_v41 = vmul.f32 %v145_v9, %v67_v26 }
  0x43   :  { %v147_v14 = vpop.eup %146 }
  0x44   :  { %v149_v16 = vpop.eup %148  ;;  %v78_v17 = vmul.f32 %v147_v14, %v54_v10 }
  0x45   :  { %v79_v21 = vmul.f32 %v149_v16, %v63_v11  ;;  %v151_v24 = vpop.eup %150 }
  0x46   :  { %v80_v23 = vsub.f32 2.0, %v78_v17  ;;  %v153_v28 = vpop.eup %152  ;;  %v56_v35 = vmul.f32 0.6931472, %v151_v24 }
  0x47   :  { %v81_v27 = vsub.f32 2.0, %v79_v21  ;;  %v65_v40 = vmul.f32 0.6931472, %v153_v28 }
  0x48   :  { %v82_v32 = vmul.f32 %v147_v14, %v80_v23  ;;  %v62_v51 = vsel %vm268_vm2, %v59_v36, %v56_v35 }
  0x49   :  { %v83_v34 = vmul.f32 %v149_v16, %v81_v27  ;;  %v71_v55 = vsel %vm272_vm3, %v68_v41, %v65_v40  ;;  %v72_v60 = vadd.f32 %v62_v51, %v52_v33 }
  0x4a   :  { %v86_v37 = vmul.f32 %v143_v8, %v82_v32  ;;  %v73_v62 = vadd.f32 %v71_v55, %v53_v47  ;;  %v117_v8 = vshrl.u32 %v114_v6, 7 }
  0x4b   :  { %v87_v42 = vmul.f32 %v145_v9, %v83_v34 }
  0x4c   :  { %v88_v44 = vsel %vm84_vm0, %v82_v32, %v86_v37  ;;  %v118_v9 = vsub.s32 %v115_v7, %v117_v8 }
  0x4d   :  { %v89_v48 = vsel %vm85_vm1, %v83_v34, %v87_v42  ;;  %v90_v49 = vsub.f32 1.0, %v88_v44  ;;  %v92_v50 = vmul.f32 %v88_v44, %v88_v44 }
  0x4e   :  { %v91_v52 = vsub.f32 1.0, %v89_v48  ;;  %v93_v53 = vmul.f32 %v89_v48, %v89_v48 }
  0x4f   :  { %v94_v56 = vmul.f32 %v90_v49, %v90_v49  ;;  %v102_v57 = vmul.f32 %v100_v38, %v92_v50 }
  0x50   :  { %v95_v58 = vmul.f32 %v91_v52, %v91_v52  ;;  %v103_v59 = vmul.f32 %v101_v46, %v93_v53 }
  0x51   :  { %v98_v61 = vmul.f32 %v96_v45, %v94_v56 }
  0x52   :  { %v99_v63 = vmul.f32 %v97_v54, %v95_v58 }
  0x53   :  { %v104_v0 = vadd.f32 %v102_v57, %v98_v61 }
  0x54   :  { %v105_v1 = vadd.f32 %v103_v59, %v99_v63 }
  0x55   :  { %v106_v2 = vmul.f32 %v104_v0, %v72_v60 }
  0x56   :  { %v107_v3 = vmul.f32 %v105_v1, %v73_v62 }
  0x58   :  { %v109_v4 = vsel %vm108_vm4, %v107_v3, 0.0 }
  0x59   :  { %v110_v5 = vadd.f32 %v109_v4, %v106_v2 }
  0x5b   :  { %111 = vadd.xlane.f32.xlu0 %v110_v5 }
  0xe8   :  { %v112_v10 = vpop.xlane.xlu0 %111 }
  0xe9   :  { %v119_v11 = vrot.slane %v112_v10, %v118_v9 }
  0xeb   :  { %122 = vst.msk [vmem:[#allocation7] sm:$0x1] %vm121_vm5, %v119_v11 }
  0xec   :  { %209 = shalt.err (!%p206_p6)
}
  0xed   :  { %s210_s9 = scalar_lea.hbm %s294_s2, 16 }
  0xee   :  { %p211_p7 = scmp.ne.s32.totalorder %s294_s2, %s210_s9  ;;  %p214_p8 = scmp.lt.u32.totalorder %s210_s9, %s294_s2 }
  0xf0   :  { %p216_p9 = pnand %p214_p8, %p211_p7 }
  0xf2   :  { %219 = shalt.err (!%p216_p9)
}
  0xf3   :  { %132 = dma.vmem_to_hbm [thread:$0]  %s130_s4, 16, %s294_s2, [#allocation4]  }
  0xf4   :  { %224 = dma.done.wait [#allocation4], 16  }
  0xf5   :  { %225 = vsyncadd [#allocation4], 4294967280 }
  0xf6   :  { %136 = vsyncpa [#allocation3], 1 }
  0xf7   :  { %137 = vsyncpa [#allocation6], 1 }
  0xf8   :  { %138 = vsyncpa [#allocation4], 1 }

</bundles_post_ra>
